<compile_context>
chip_gen: v7x
topology: tpu7x:2x2x1
jax: 0.10.0
libtpu: 0.0.40
codegen_flags: <defaults>
</compile_context>

<pallas_src>
import jax
import jax.numpy as jnp
from jax.experimental import pallas as pl
from jax.experimental.pallas import tpu as pltpu

_LANE = 128
_TARGET_BLOCK_BYTES = 2 << 20   # ~2 MiB per block (VMEM-padded accounting)
_SPLIT_BYTES = 512 << 10        # only force >=2 grid steps above this size


def _elementwise_kernel(x_ref, o_ref):
    # ((x + 2) * 3 / 4 - 1) + (0 + 1 + 2 + 3 + 4)  ==  x * 0.75 + 10.5
    # 0.75 and 10.5 are exactly representable in f32/bf16, so the fold is exact.
    o_ref[...] = x_ref[...] * 0.75 + 10.5


def _round_up(v, m):
    return -(-v // m) * m


def _launch(x3d, grid, block_shape, index_map, n, itemsize):
    B, H, W = x3d.shape
    return pl.pallas_call(
        _elementwise_kernel,
        out_shape=jax.ShapeDtypeStruct((B, H, W), x3d.dtype),
        grid_spec=pltpu.PrefetchScalarGridSpec(
            num_scalar_prefetch=0,
            grid=grid,
            in_specs=[pl.BlockSpec(block_shape, index_map)],
            out_specs=pl.BlockSpec(block_shape, index_map),
        ),
        compiler_params=pltpu.CompilerParams(
            dimension_semantics=("parallel",) * len(grid),
        ),
        cost_estimate=pl.CostEstimate(
            flops=2 * n, transcendentals=0, bytes_accessed=2 * n * itemsize),
    )(x3d)


def _pt_module_forward_impl(x):
    """PtModule.forward as a single layout-preserving elementwise Pallas kernel."""
    orig_shape = x.shape
    n = int(x.size)

    # torch.div promotes integer/bool inputs to float; emulate that.
    if not jnp.issubdtype(x.dtype, jnp.floating):
        x = x.astype(jnp.float32)
    if n == 0:
        return x

    itemsize = jnp.dtype(x.dtype).itemsize
    sublane = max(8, 32 // itemsize)          # 8 rows f32, 16 bf16, 32 int8/fp8

    # Collapse everything above the trailing two dims into one leading axis.
    # TPU tiling only involves the trailing two dims, so this reshape (and the
    # inverse on the output) is a bitcast, not an HBM relayout copy.
    if x.ndim >= 2:
        H, W = x.shape[-2], x.shape[-1]
    elif x.ndim == 1:
        H, W = 1, x.shape[0]
    else:
        H, W = 1, 1
    B = n // (H * W)
    x3d = x.reshape(B, H, W)

    total_bytes = n * itemsize
    row_padded_bytes = _round_up(W, _LANE) * itemsize
    plane_padded_bytes = _round_up(H, sublane) * row_padded_bytes

    if plane_padded_bytes <= _TARGET_BLOCK_BYTES:
        # --- Whole (H, W) planes per block; tile along the leading axis.
        # Block's trailing dims equal the full array dims -> no (8,128)
        # divisibility requirement, no data padding needed.
        tb_cap = max(1, _TARGET_BLOCK_BYTES // plane_padded_bytes)
        if total_bytes >= _SPLIT_BYTES and B >= 2:
            # Enough data to want >=2 near-equal blocks (v7x: 2 TensorCores);
            # aim for an even block count so neither core idles on a tail.
            nblk = max(2, pl.cdiv(B, tb_cap))
            if nblk % 2:
                nblk += 1
            tb = max(1, pl.cdiv(B, nblk))
        else:
            tb = min(B, tb_cap)
        grid = (pl.cdiv(B, tb),)
        out3d = _launch(x3d, grid, (tb, H, W), lambda i: (i, 0, 0), n, itemsize)
    else:
        # --- Plane too large for one block: tile rows (and lanes if a single
        # row group would already blow the target) inside each plane.
        if row_padded_bytes * sublane <= _TARGET_BLOCK_BYTES:
            tw = W                                           # full rows, contiguous DMA
            th_cap = _TARGET_BLOCK_BYTES // row_padded_bytes
            th = min(H, max(sublane, (th_cap // sublane) * sublane))
            if th < H and H % th:
                # Near-equal row blocks (never larger than the original th).
                th = min(H, _round_up(pl.cdiv(H, pl.cdiv(H, th)), sublane))
        else:
            th = min(H, sublane)
            th_pad = _round_up(th, sublane)
            tw_cap = max(_LANE, _TARGET_BLOCK_BYTES // (th_pad * itemsize))
            tw = min(W, (tw_cap // _LANE) * _LANE)
        grid = (B, pl.cdiv(H, th), pl.cdiv(W, tw))
        out3d = _launch(x3d, grid, (1, th, tw),
                        lambda b, i, j: (b, i, j), n, itemsize)

    return out3d.reshape(orig_shape)


# jit so the surrounding (bitcast) reshapes don't become standalone HLO ops.
pt_module_forward = jax.jit(_pt_module_forward_impl)


if __name__ == "__main__":
    key = jax.random.PRNGKey(0)
    x = jax.random.normal(key, (2, 4, 16, 16), dtype=jnp.float32)

    y = pt_module_forward(x)
    jax.block_until_ready(y)

    # Reference check (plain JAX, original op chain).
    ref = x
    ref = ref + 2
    ref = ref * 3
    ref = ref / 4
    ref = ref - 1
    for i in range(5):
        ref = ref + i

    assert y.shape == ref.shape and y.dtype == ref.dtype
    assert jnp.allclose(y, ref, atol=1e-5, rtol=1e-5), "mismatch vs reference"

    print("KERNEL_OK")
</pallas_src>

<mosaic_0001>
module attributes {stable_mosaic.version = 11 : i64} {
  func.func @_elementwise_kernel(%arg0: i32, %arg1: memref<8x16x16xf32, #tpu.memory_space<vmem>>, %arg2: memref<8x16x16xf32, #tpu.memory_space<vmem>>) attributes {dimension_semantics = [#tpu.dimension_semantics<parallel>], iteration_bounds = array<i64: 1>, scalar_prefetch = 0 : i64, scratch_operands = 0 : i64, tpu.core_type = #tpu.core_type<tc>, window_params = [{transform_indices = @transform_0, window_bounds = array<i64: 8, 16, 16>}, {transform_indices = @transform_1, window_bounds = array<i64: 8, 16, 16>}]} {
    %c0 = arith.constant 0 : index
    %c0_0 = arith.constant 0 : index
    %c0_1 = arith.constant 0 : index
    %0 = vector.load %arg1[%c0, %c0_0, %c0_1] : memref<8x16x16xf32, #tpu.memory_space<vmem>>, vector<8x16x16xf32>
    %cst = arith.constant 7.500000e-01 : f32
    %1 = vector.broadcast %cst : f32 to vector<8x16x16xf32>
    %2 = arith.mulf %0, %1 : vector<8x16x16xf32>
    %cst_2 = arith.constant 1.050000e+01 : f32
    %3 = vector.broadcast %cst_2 : f32 to vector<8x16x16xf32>
    %4 = arith.addf %2, %3 : vector<8x16x16xf32>
    %c0_3 = arith.constant 0 : index
    %c0_4 = arith.constant 0 : index
    %c0_5 = arith.constant 0 : index
    %5 = vector.load %arg2[%c0_3, %c0_4, %c0_5] : memref<8x16x16xf32, #tpu.memory_space<vmem>>, vector<8x16x16xf32>
    tpu.vector_store %arg2[%c0_3, %c0_4, %c0_5], %4 {strides = array<i32>} : memref<8x16x16xf32, #tpu.memory_space<vmem>>, vector<8x16x16xf32>,
    return
  }
  func.func @transform_0(%arg0: i32) -> (i32, i32, i32) {
    %c0_i32 = arith.constant 0 : i32
    %c0_i32_0 = arith.constant 0 : i32
    %c0_i32_1 = arith.constant 0 : i32
    return %arg0, %c0_i32, %c0_i32_0 : i32, i32, i32
  }
  func.func @transform_1(%arg0: i32) -> (i32, i32, i32) {
    %c0_i32 = arith.constant 0 : i32
    %c0_i32_0 = arith.constant 0 : i32
    %c0_i32_1 = arith.constant 0 : i32
    return %arg0, %c0_i32, %c0_i32_0 : i32, i32, i32
  }
}

</mosaic_0001>

<bundles_post_ra>
// kernel: _pt_module_forward_impl.1
= control target key start
LH: loop header
LB: loop body
LE: loop exit
PB: predicated region body
PF: predicated region fallthrough
CT: control target
= control target key end

     0   :  { %6 = vsyncpa [#allocation3], 0  ;;  %s217_s0 = inlined_call_operand.hbm [shape: f32[8,16,16], index: 0, kind: input, shape index: {}]   ;;  %s218_s1 = inlined_call_operand.hbm [shape: f32[8,16,16], index: 1, kind: output, shape index: {}]  }
   0x1   :  { %7 = vsyncpa [#allocation4], 0  ;;  %s157_s6 = smov [#allocation2]   ;;  %s109_s10 = scalar_lea.hbm %s217_s0, 2048 }
   0x2   :  { %s13_s7 = sshll.u32 %s157_s6, 4  ;;  %p110_p0 = scmp.ne.s32.totalorder %s217_s0, %s109_s10  ;;  %s14_s7 = int_to_ptr.vmem [resolvable:$true] %s13_s7 }
   0x3   :  { %p113_p1 = scmp.lt.u32.totalorder %s109_s10, %s217_s0 }
   0x5   :  { %p115_p2 = pnand %p113_p1, %p110_p0 }
   0x7   :  { %118 = shalt.err (!%p115_p2)
}
   0x8   :  { %s119_s15 = scalar_lea.vmem %s14_s7, 2048  ;;  %p124_p4 = scmp.lt.s32.totalorder %s14_s7, %s14_s7 }
   0x9   :  { %p120_p3 = scmp.ne.s32.totalorder %s14_s7, %s119_s15  ;;  %p125_p5 = scmp.lt.s32.totalorder %s119_s15, %s119_s15 }
   0xb   :  { %p126_p6 = por %p125_p5, %p124_p4 }
   0xd   :  { %p127_p7 = pnand %p126_p6, %p120_p3 }
   0xf   :  { %130 = shalt.err (!%p127_p7)
}
  0x10   :  { %s158_s16 = smov 128   ;;  %s159_s17 = smov 8  }
  0x11   :  { %19 = dma.hbm_to_vmem [thread:$0]  %s217_s0, 2048, %s14_s7, [#allocation3], %s158_s16, %s158_s16, %s159_s17  }
  0x12   :  { %153 = dma.done.wait [#allocation3], 2048  }
  0x13   :  { %154 = vsyncadd [#allocation3], 4294965248  ;;  %v23_v0 = vld [vmem:[#allocation2] sm:$0xff]  ;;  %vm71_vm0 = vcmask 130048   ;;  %v24_v1 = vld [vmem:[#allocation2 + $0x8] sm:$0xff]  ;;  %s160_s0 = smov [#allocation5]  }
  0x14   :  { %v25_v2 = vld [vmem:[#allocation2 + $0x10] sm:$0xff]  ;;  %v39_v3 = vmul.f32 0.75, %v23_v0  ;;  %v40_v4 = vmul.f32 0.75, %v24_v1  ;;  %v26_v6 = vld [vmem:[#allocation2 + $0x18] sm:$0xff]  ;;  %v27_v7 = vld [vmem:[#allocation2 + $0x20] sm:$0xff]  ;;  %s93_s20 = sshll.u32 %s160_s0, 4  ;;  %s94_s20 = int_to_ptr.vmem [resolvable:$true] %s93_s20 }
  0x15   :  { %v41_v5 = vmul.f32 0.75, %v25_v2  ;;  %v28_v8 = vld [vmem:[#allocation2 + $0x28] sm:$0xff]  ;;  %v42_v9 = vmul.f32 0.75, %v26_v6  ;;  %v43_v10 = vmul.f32 0.75, %v27_v7  ;;  %v29_v12 = vld [vmem:[#allocation2 + $0x30] sm:$0xff]  ;;  %v30_v13 = vld [vmem:[#allocation2 + $0x38] sm:$0xff]  ;;  %p136_p9 = scmp.lt.s32.totalorder %s94_s20, %s94_s20 }
  0x16   :  { %v44_v11 = vmul.f32 0.75, %v28_v8  ;;  %v31_v14 = vld [vmem:[#allocation2 + $0x40] sm:$0xff]  ;;  %v55_v15 = vadd.f32 10.5, %v39_v3  ;;  %v56_v16 = vadd.f32 10.5, %v40_v4  ;;  %v45_v18 = vmul.f32 0.75, %v29_v12  ;;  %v32_v19 = vld [vmem:[#allocation2 + $0x48] sm:$0xff] }
  0x17   :  { %v57_v17 = vadd.f32 10.5, %v41_v5  ;;  %v33_v20 = vld [vmem:[#allocation2 + $0x50] sm:$0xff]  ;;  %v58_v21 = vadd.f32 10.5, %v42_v9  ;;  %v59_v22 = vadd.f32 10.5, %v43_v10  ;;  %v46_v24 = vmul.f32 0.75, %v30_v13  ;;  %v34_v25 = vld [vmem:[#allocation2 + $0x58] sm:$0xff] }
  0x18   :  { %v60_v23 = vadd.f32 10.5, %v44_v11  ;;  %v35_v26 = vld [vmem:[#allocation2 + $0x60] sm:$0xff]  ;;  %72 = vst.msk [vmem:[#allocation5] sm:$0xff] %vm71_vm0, %v55_v15  ;;  %73 = vst.msk [vmem:[#allocation5 + $0x8] sm:$0xff] %vm71_vm0, %v56_v16  ;;  %v61_v27 = vadd.f32 10.5, %v45_v18  ;;  %v47_v28 = vmul.f32 0.75, %v31_v14 }
  0x19   :  { %74 = vst.msk [vmem:[#allocation5 + $0x10] sm:$0xff] %vm71_vm0, %v57_v17  ;;  %v48_v29 = vmul.f32 0.75, %v32_v19  ;;  %v49_v30 = vmul.f32 0.75, %v33_v20  ;;  %v36_v31 = vld [vmem:[#allocation2 + $0x68] sm:$0xff]  ;;  %v37_v32 = vld [vmem:[#allocation2 + $0x70] sm:$0xff]  ;;  %75 = vst.msk [vmem:[#allocation5 + $0x18] sm:$0xff] %vm71_vm0, %v58_v21 }
  0x1a   :  { %76 = vst.msk [vmem:[#allocation5 + $0x20] sm:$0xff] %vm71_vm0, %v59_v22  ;;  %77 = vst.msk [vmem:[#allocation5 + $0x28] sm:$0xff] %vm71_vm0, %v60_v23  ;;  %v62_v33 = vadd.f32 10.5, %v46_v24  ;;  %v50_v34 = vmul.f32 0.75, %v34_v25  ;;  %v51_v35 = vmul.f32 0.75, %v35_v26  ;;  %v52_v36 = vmul.f32 0.75, %v36_v31 }
  0x1b   :  { %v38_v37 = vld [vmem:[#allocation2 + $0x78] sm:$0xff]  ;;  %78 = vst.msk [vmem:[#allocation5 + $0x30] sm:$0xff] %vm71_vm0, %v61_v27  ;;  %v63_v38 = vadd.f32 10.5, %v47_v28  ;;  %v64_v39 = vadd.f32 10.5, %v48_v29  ;;  %v65_v40 = vadd.f32 10.5, %v49_v30  ;;  %v53_v41 = vmul.f32 0.75, %v37_v32 }
  0x1c   :  { %79 = vst.msk [vmem:[#allocation5 + $0x38] sm:$0xff] %vm71_vm0, %v62_v33  ;;  %v66_v42 = vadd.f32 10.5, %v50_v34  ;;  %v67_v43 = vadd.f32 10.5, %v51_v35  ;;  %v68_v44 = vadd.f32 10.5, %v52_v36  ;;  %v54_v45 = vmul.f32 0.75, %v38_v37  ;;  %s131_s21 = scalar_lea.vmem %s94_s20, 2048 }
  0x1d   :  { %80 = vst.msk [vmem:[#allocation5 + $0x40] sm:$0xff] %vm71_vm0, %v63_v38  ;;  %81 = vst.msk [vmem:[#allocation5 + $0x48] sm:$0xff] %vm71_vm0, %v64_v39  ;;  %v69_v46 = vadd.f32 10.5, %v53_v41  ;;  %p132_p8 = scmp.ne.s32.totalorder %s94_s20, %s131_s21  ;;  %p137_p10 = scmp.lt.s32.totalorder %s131_s21, %s131_s21 }
  0x1e   :  { %82 = vst.msk [vmem:[#allocation5 + $0x50] sm:$0xff] %vm71_vm0, %v65_v40  ;;  %83 = vst.msk [vmem:[#allocation5 + $0x58] sm:$0xff] %vm71_vm0, %v66_v42  ;;  %v70_v47 = vadd.f32 10.5, %v54_v45 }
  0x1f   :  { %84 = vst.msk [vmem:[#allocation5 + $0x60] sm:$0xff] %vm71_vm0, %v67_v43  ;;  %85 = vst.msk [vmem:[#allocation5 + $0x68] sm:$0xff] %vm71_vm0, %v68_v44  ;;  %p138_p11 = por %p137_p10, %p136_p9 }
  0x20   :  { %86 = vst.msk [vmem:[#allocation5 + $0x70] sm:$0xff] %vm71_vm0, %v69_v46  ;;  %87 = vst.msk [vmem:[#allocation5 + $0x78] sm:$0xff] %vm71_vm0, %v70_v47 }
  0x21   :  { %p139_p12 = pnand %p138_p11, %p132_p8 }
  0x23   :  { %142 = shalt.err (!%p139_p12)
}
  0x24   :  { %s143_s24 = scalar_lea.hbm %s218_s1, 2048 }
  0x25   :  { %p144_p13 = scmp.ne.s32.totalorder %s218_s1, %s143_s24  ;;  %p147_p0 = scmp.lt.u32.totalorder %s143_s24, %s218_s1 }
  0x27   :  { %p149_p1 = pnand %p147_p0, %p144_p13 }
  0x29   :  { %152 = shalt.err (!%p149_p1)
}
  0x2a   :  { %99 = dma.vmem_to_hbm [thread:$0]  %s94_s20, 2048, %s218_s1, [#allocation4], %s158_s16, %s158_s16, %s159_s17  }
  0x2b   :  { %155 = dma.done.wait [#allocation4], 2048  }
  0x2c   :  { %156 = vsyncadd [#allocation4], 4294965248 }
  0x2d   :  { %103 = vsyncpa [#allocation3], 1 }
  0x2e   :  { %104 = vsyncpa [#allocation4], 1 }

</bundles_post_ra>
